<compile_context>
chip_gen: v7x
topology: tpu7x:2x2x1
jax: 0.10.0
libtpu: 0.0.40
codegen_flags: <defaults>
</compile_context>

<pallas_src>
import functools
import math

import jax
import jax.numpy as jnp
from jax.experimental import pallas as pl
from jax.experimental.pallas import tpu as pltpu


# ---------------------------------------------------------------------------
# l_neg = q @ memory.T   (grid over queue tiles; bank streamed HBM -> VMEM)
# ---------------------------------------------------------------------------
def _neg_scores_kernel(q_ref, mem_ref, neg_ref, *, inv_T, use_softmax):
    # q_ref: (B, D) resident; mem_ref: (tile_k, D) streamed; neg_ref: (B, tile_k)
    a = q_ref[...]
    b = mem_ref[...]
    if a.dtype != b.dtype:            # bf16 bank: bf16 x bf16 -> f32 on the MXU
        a = a.astype(b.dtype)
    s = jax.lax.dot_general(a, b, (((1,), (1,)), ((), ())),
                            preferred_element_type=jnp.float32) * inv_T
    if not use_softmax:
        s = jnp.exp(s)                # EUP slot; overlaps with the next tile's DMA
    neg_ref[...] = s


# ---------------------------------------------------------------------------
# circular queue update: memory[(index + arange(B)) % Q] = k
#   * bank stays in HBM and is aliased input->output (no full-bank copy)
#   * common case = ONE contiguous B-row DMA; wrapped window falls back to row DMAs
# ---------------------------------------------------------------------------
def _queue_update_kernel(idx_ref, k_ref, mem_in_ref, mem_out_ref, sem, *, B, Q):
    del mem_in_ref                    # aliased with mem_out_ref; untouched rows survive
    idx = idx_ref[0]
    no_wrap = idx + B <= Q

    @pl.when(no_wrap)
    def _():
        cp = pltpu.make_async_copy(k_ref, mem_out_ref.at[pl.ds(idx, B)], sem.at[0])
        cp.start()
        cp.wait()

    @pl.when(jnp.logical_not(no_wrap))
    def _():                          # rare wrapped window: B row DMAs
        for b in range(B):
            pltpu.make_async_copy(k_ref.at[b], mem_out_ref.at[(idx + b) % Q],
                                  sem.at[b]).start()
        for b in range(B):
            pltpu.make_async_copy(k_ref.at[b], mem_out_ref.at[(idx + b) % Q],
                                  sem.at[b]).wait()


def _pick_queue_tile(Q, D, B, mem_itemsize, vmem_budget_bytes=12 << 20):
    """Largest queue tile whose double-buffered working set fits under the v5e
    16 MiB default scoped-VMEM limit (v6e/v7x defaults are 32 MiB, so v5e is the
    tight one).  Big tiles amortise the ~0.35 us per-grid-step overhead."""
    def fits(t):
        need = (2 * t * D * mem_itemsize      # bank tile, double-buffered
                + 2 * B * t * 4               # (B, tile) f32 output, double-buffered
                + 2 * B * D * 4)              # resident q
        return need <= vmem_budget_bytes
    for t in (8192, 4096, 2048, 1024, 512, 256, 128):
        if Q % t == 0 and fits(t):
            return t
    return Q                                   # tiny queues: one step over the whole bank


# ---------------------------------------------------------------------------
# wrapper (functional MemoryMoCo.forward)
# ---------------------------------------------------------------------------
def memory_moco_forward(q, k, memory, Z, index, *, outputSize, T=0.07,
                        use_softmax=False, tile_k=None):
    """Returns (out, new_memory, new_Z, new_index).  The torch module mutates its
    buffers / python `index` in place; here the updated state is returned.
    `memory` may be float32 or bfloat16 (bf16 halves the dominant HBM stream)."""
    q = jnp.asarray(q, jnp.float32)
    k = jnp.asarray(k, jnp.float32)        # "k.detach()" is a no-op here
    B, D = q.shape
    Q = memory.shape[0]
    assert B <= Q, "batch may not exceed the queue size (circular-write race)"
    if tile_k is None:
        tile_k = _pick_queue_tile(Q, D, B, jnp.dtype(memory.dtype).itemsize)
    assert Q % tile_k == 0
    inv_T = 1.0 / float(T)                 # T is a python hyperparameter

    # ---- l_neg: queue streamed HBM->VMEM in big lane-dense tiles --------------
    l_neg = pl.pallas_call(
        functools.partial(_neg_scores_kernel, inv_T=inv_T, use_softmax=use_softmax),
        out_shape=jax.ShapeDtypeStruct((B, Q), jnp.float32),
        grid=(Q // tile_k,),
        in_specs=[pl.BlockSpec((B, D), lambda j: (0, 0)),         # q stays resident
                  pl.BlockSpec((tile_k, D), lambda j: (j, 0))],   # queue tile
        out_specs=pl.BlockSpec((B, tile_k), lambda j: (0, j)),
        compiler_params=pltpu.CompilerParams(
            dimension_semantics=("parallel",)),   # megacore-splits the stream on v7x
    )(q, memory)

    # ---- l_pos: tiny rowwise q.k; XLA fuses it with the epilogue below --------
    l_pos = jnp.sum(q * k, axis=1, keepdims=True) * inv_T
    if not use_softmax:
        l_pos = jnp.exp(l_pos)

    Zf = jnp.asarray(Z, jnp.float32)
    if use_softmax:
        out = jnp.concatenate([l_pos, l_neg], axis=1)
        new_Z = Zf
    else:
        # Z bootstrap gated by lax.cond: the full reduction only runs when Z < 0.
        # TODO(synk): host-side print of the freshly set Z is omitted.
        new_Z = jax.lax.cond(
            Zf < 0,
            lambda: (jnp.sum(l_neg) + jnp.sum(l_pos))
                    * (float(outputSize) / float(B * (Q + 1))),
            lambda: Zf)
        out = jnp.concatenate([l_pos, l_neg], axis=1) / new_Z
    # torch's .squeeze() is a no-op for B > 1; keep (B, Q+1).

    # ---- queue update: DMA-scatter the B rows of k into the HBM-resident bank -
    k_store = k.astype(memory.dtype)
    idx_arr = jnp.reshape(jnp.asarray(index, jnp.int32) % Q, (1,))
    new_memory = pl.pallas_call(
        functools.partial(_queue_update_kernel, B=B, Q=Q),
        out_shape=jax.ShapeDtypeStruct((Q, D), memory.dtype),
        in_specs=[pl.BlockSpec(memory_space=pltpu.MemorySpace.SMEM),   # write pointer
                  pl.BlockSpec(memory_space=pl.ANY),                   # k (HBM)
                  pl.BlockSpec(memory_space=pl.ANY)],                  # memory (HBM)
        out_specs=pl.BlockSpec(memory_space=pl.ANY),
        scratch_shapes=[pltpu.SemaphoreType.DMA((B,))],
        # NOTE: to truly avoid a defensive full-bank copy inside jit, also donate
        # `memory` at the jit boundary.
        input_output_aliases={2: 0},
    )(idx_arr, k_store, memory)

    new_index = (index + B) % Q
    return out, new_memory, new_Z, new_index


# ---------------------------------------------------------------------------
if __name__ == "__main__":
    inputSize = 128        # D (lane-aligned)
    queueSize = 2048       # K: queue length
    outputSize = 4096      # number of instances; only enters the Z constant
    T = 0.07
    B = 8                  # batch (fills the sublane dim)

    key = jax.random.PRNGKey(0)
    kmem, kq1, kk1, kq2, kk2 = jax.random.split(key, 5)

    # __init__: memory ~ U(-stdv, stdv), params = [-1]  (Z unset)
    stdv = 1.0 / math.sqrt(inputSize / 3)
    memory_f32 = jax.random.uniform(kmem, (queueSize, inputSize), jnp.float32,
                                    minval=-stdv, maxval=stdv)

    def make_feats(kk):
        x = jax.random.normal(kk, (B, inputSize), jnp.float32)
        return x / jnp.linalg.norm(x, axis=1, keepdims=True)

    q1, k1 = make_feats(kq1), make_feats(kk1)
    q2, k2 = make_feats(kq2), make_feats(kk2)

    # ---- pure-JAX reference of MemoryMoCo.forward (non-softmax branch) --------
    def reference(q, kf, memory, Z, index):
        memf = memory.astype(jnp.float32)
        # match the kernel's bf16 x bf16 -> f32 MXU path when the bank is bf16
        qn = (q.astype(jnp.bfloat16).astype(jnp.float32)
              if memory.dtype == jnp.bfloat16 else q)
        l_pos = jnp.sum(q * kf, axis=1, keepdims=True)
        l_neg = qn @ memf.T
        out = jnp.exp(jnp.concatenate([l_pos, l_neg], axis=1) / T)
        Zr = jnp.where(Z < 0, jnp.mean(out) * outputSize, Z)
        out = out / Zr
        ids = (index + jnp.arange(B)) % queueSize
        mem = memory.at[ids].set(kf.astype(memory.dtype))
        return out, mem, Zr, (index + B) % queueSize

    # ============ run 1: bf16 bank, wrapped write window, Z bootstrap ==========
    mem0 = memory_f32.astype(jnp.bfloat16)
    Z0, idx0 = jnp.float32(-1.0), queueSize - 5          # idx0 + B > Q -> wraps

    out1, mem1, Z1, idx1 = memory_moco_forward(
        q1, k1, mem0, Z0, idx0, outputSize=outputSize, T=T, tile_k=512)
    jax.block_until_ready((out1, mem1, Z1))
    out1_r, mem1_r, Z1_r, idx1_r = reference(q1, k1, mem0, Z0, idx0)

    assert out1.shape == (B, queueSize + 1)
    assert jnp.allclose(out1, out1_r, rtol=5e-3, atol=1e-9), \
        float(jnp.max(jnp.abs(out1 - out1_r)))
    assert jnp.allclose(Z1, Z1_r, rtol=5e-3), (float(Z1), float(Z1_r))
    assert jnp.array_equal(mem1, mem1_r)
    assert int(idx1) == int(idx1_r)

    # ============ run 2: steady state (Z already set), contiguous write ========
    out2, mem2, Z2, idx2 = memory_moco_forward(
        q2, k2, mem1, Z1, idx1, outputSize=outputSize, T=T)    # auto tile_k
    jax.block_until_ready((out2, mem2, Z2))
    out2_r, mem2_r, Z2_r, idx2_r = reference(q2, k2, mem1, Z1, idx1)

    assert jnp.allclose(out2, out2_r, rtol=5e-3, atol=1e-9)
    assert jnp.allclose(Z2, Z2_r, rtol=5e-3)
    assert jnp.array_equal(mem2, mem2_r)
    assert int(idx2) == int(idx2_r)

    # ============ run 3: float32 bank ===========================================
    # Default MXU precision uses bf16 passes; through exp(x/0.07) small logit
    # deltas are amplified ~14x, so check the raw logits tightly and the
    # exp/Z-normalised output only loosely.
    out3, mem3, Z3, idx3 = memory_moco_forward(
        q1, k1, memory_f32, jnp.float32(-1.0), 0,
        outputSize=outputSize, T=T, tile_k=512)
    jax.block_until_ready((out3, mem3, Z3))
    out3_r, mem3_r, Z3_r, idx3_r = reference(q1, k1, memory_f32, jnp.float32(-1.0), 0)

    lg3 = T * jnp.log(out3 * Z3)          # reconstructed logits (undo exp and 1/Z)
    lg3_r = T * jnp.log(out3_r * Z3_r)
    assert jnp.allclose(lg3, lg3_r, rtol=0.0, atol=2e-2), \
        float(jnp.max(jnp.abs(lg3 - lg3_r)))
    assert jnp.allclose(out3, out3_r, rtol=0.3, atol=1e-9)
    assert jnp.allclose(Z3, Z3_r, rtol=0.1)
    assert jnp.array_equal(mem3, mem3_r)
    assert int(idx3) == int(idx3_r)

    print("KERNEL_OK")
</pallas_src>

<mosaic_0001>
module attributes {stable_mosaic.version = 11 : i64} {
  func.func @_neg_scores_kernel(%arg0: i32, %arg1: memref<8x128xf32, #tpu.memory_space<vmem>>, %arg2: memref<512x128xbf16, #tpu.memory_space<vmem>>, %arg3: memref<8x512xf32, #tpu.memory_space<vmem>>) attributes {dimension_semantics = [#tpu.dimension_semantics<parallel>], iteration_bounds = array<i64: 4>, scalar_prefetch = 0 : i64, scratch_operands = 0 : i64, tpu.core_type = #tpu.core_type<tc>, window_params = [{pipeline_mode = #tpu.pipeline_mode<synchronous>, transform_indices = @transform_0, window_bounds = array<i64: 8, 128>}, {transform_indices = @transform_1, window_bounds = array<i64: 512, 128>}, {transform_indices = @transform_2, window_bounds = array<i64: 8, 512>}]} {
    %c0 = arith.constant 0 : index
    %c0_0 = arith.constant 0 : index
    %0 = vector.load %arg1[%c0, %c0_0] : memref<8x128xf32, #tpu.memory_space<vmem>>, vector<8x128xf32>
    %c0_1 = arith.constant 0 : index
    %c0_2 = arith.constant 0 : index
    %1 = vector.load %arg2[%c0_1, %c0_2] : memref<512x128xbf16, #tpu.memory_space<vmem>>, vector<512x128xbf16>
    %2 = arith.truncf %0 : vector<8x128xf32> to vector<8x128xbf16>
    %cst = arith.constant dense<0.000000e+00> : vector<8x512xf32>
    %3 = tpu.matmul %2, %1, %cst {dimension_numbers = #tpu.dot_dimension_numbers<[1], [1], [0], [0], [0, 0, 1, 0], [], []>} : vector<8x128xbf16>, vector<512x128xbf16>, vector<8x512xf32> -> vector<8x512xf32>
    %cst_3 = arith.constant 14.2857141 : f32
    %4 = vector.broadcast %cst_3 : f32 to vector<8x512xf32>
    %5 = arith.mulf %3, %4 : vector<8x512xf32>
    %6 = math.exp %5 : vector<8x512xf32>
    %c0_4 = arith.constant 0 : index
    %c0_5 = arith.constant 0 : index
    %7 = vector.load %arg3[%c0_4, %c0_5] : memref<8x512xf32, #tpu.memory_space<vmem>>, vector<8x512xf32>
    tpu.vector_store %arg3[%c0_4, %c0_5], %6 {strides = array<i32>} : memref<8x512xf32, #tpu.memory_space<vmem>>, vector<8x512xf32>,
    return
  }
  func.func @transform_0(%arg0: i32) -> (i32, i32) {
    %c0_i32 = arith.constant 0 : i32
    %c0_i32_0 = arith.constant 0 : i32
    %c0_i32_1 = arith.constant 0 : i32
    return %c0_i32, %c0_i32_0 : i32, i32
  }
  func.func @transform_1(%arg0: i32) -> (i32, i32) {
    %c0_i32 = arith.constant 0 : i32
    %c0_i32_0 = arith.constant 0 : i32
    return %arg0, %c0_i32 : i32, i32
  }
  func.func @transform_2(%arg0: i32) -> (i32, i32) {
    %c0_i32 = arith.constant 0 : i32
    %c0_i32_0 = arith.constant 0 : i32
    return %c0_i32, %arg0 : i32, i32
  }
}

</mosaic_0001>

<bundles_post_ra>
// kernel: tpu_custom_call.1
= control target key start
LH: loop header
LB: loop body
LE: loop exit
PB: predicated region body
PF: predicated region fallthrough
CT: control target
= control target key end

     0   :  { %7 = vsyncpa [#allocation3], 0  ;;  %s1195_s0 = inlined_call_operand.hbm [shape: f32[8,128], index: 0, kind: input, shape index: {}]   ;;  %s1196_s1 = inlined_call_operand.hbm [shape: bf16[2048,128], index: 1, kind: input, shape index: {}]   ;;  %s1197_s2 = inlined_call_operand.hbm [shape: f32[8,2048], index: 2, kind: output, shape index: {}]  }
   0x1   :  { %8 = vsyncpa [#allocation6], 0 }
   0x2   :  { %10 = vsyncpa [#allocation6 + $0x1], 0 }
   0x3   :  { %11 = vsyncpa [#allocation4], 0 }
   0x4   :  { %13 = vsyncpa [#allocation4 + $0x1], 0  ;;  %s966_s9 = smov 0   ;;  %s968_s10 = smov 0  }
   0x5   :  { %s970_s11 = smov 0   ;;  %s972_s12 = smov 0  }
   0x6 LB: > { %s987_s13 = sadd.s32 4294967295, %s944_s12   ;;  %s631_s14 = sadd.s32 4294967294, %s944_s12   ;;  %s944_s12 = sphi %s972_s12, %s1220_s12   ;;  %s940_s11 = sphi %s970_s11, %s1219_s11   ;;  %s936_s10 = sphi %s968_s10, %s1218_s10   ;;  %s932_s9 = sphi %s966_s9, %s1217_s9  }
   0x7   : > { %s991_s15 = sadd.s32 1, %s944_s12   ;;  %s47_s16 = sadd.s32 1, %s940_s11 }
   0x8   : > { %s44_s17 = ssub.s32 %s944_s12, %s991_s15  ;;  %p54_p0 = scmp.ne.s32.totalorder %s940_s11, %s936_s10 }
   0x9   : > { %p45_p1 = scmp.eq.s32.totalorder %s44_s17, 0  ;;  %p55_p2 = scmp.eq.s32.totalorder %s944_s12, 0 }
   0xa   : > { %p60_p3 = scmp.ne.s32.totalorder %s936_s10, %s932_s9  ;;  %p1198_p4 = scmp.eq.s32.totalorder %s987_s13, 0 }
   0xb   : > { %s1003_s18 = scalar_select %p45_p1, %s940_s11, %s47_s16  }
   0xc   : > { %p1005_p5 = por %p55_p2, %p54_p0  ;;  %p1011_p6 = por %p1198_p4, %p60_p3 }
   0xd   : > { %p84_p7 = scmp.eq.s32.totalorder %s987_s13, 3  ;;  %p90_p8 = scmp.eq.s32.totalorder %s631_s14, 3 }
   0xe   : > { %s1204_s20 = scalar_select %p1011_p6, 1, 0 }
   0xf   : > { %p632_p9 = scmp.ge.s32.totalorder %s944_s12, 1  ;;  %p97_p10 = scmp.lt.s32.totalorder %s944_s12, 5 }
  0x10   : > { %p1018_p11 = por %p84_p7, %p54_p0  ;;  %p1022_p12 = por %p90_p8, %p60_p3 }
  0x11   : > { %p1026_p13 = pnand %p632_p9, %p97_p10  ;;  %s946_s24 = smov [#allocation2]  }
  0x12   : > { %s1205_s21 = scalar_select %p1018_p11, 1, 0 }
  0x13   : > { %s1206_s22 = scalar_select %p1022_p12, 1, 0 }
  0x14   : > { %s1207_s23 = scalar_select %p1026_p13, 1, 0 }
  0x15   : > { %p725_p1 = pneg %p1026_p13  ;;  %s110_s25 = sshll.u32 %s946_s24, 4  ;;  %s111_s25 = int_to_ptr.vmem [resolvable:$true] %s110_s25 }
  0x16   : > { %p738_p2 = scmp.lt.s32.totalorder %s944_s12, 4  ;;  %s121_s27 = sand.u32 1, %s940_s11  }
  0x17   : > { %p1035_p0 = pnand %p725_p1, %p1198_p4  ;;  %s635_s29 = sshll.u32 %s121_s27, 8 }
  0x18   : > { %p1042_p3 = pnand %p738_p2, %p1005_p5  ;;  %s816_s4 = scalar_lea.hbm %s1195_s0, 128 }
  0x19   : > { %p817_p7 = scmp.ne.s32.totalorder %s1195_s0, %s816_s4  ;;  %p818_p8 = pneg %p1035_p0 }
  0x1a   : > { %s1209_s28 = scalar_select %p1042_p3, 1, 0 }
  0x1b   : > { %p819_p9 = pnand %p818_p8, %p817_p7  ;;  %p823_p5 = scmp.lt.u32.totalorder %s816_s4, %s1195_s0 }
  0x1d   : > { %p820_p10 = pneg %p819_p9 }
  0x1f   : > { %p825_p1 = pnand %p823_p5, %p820_p10 }
  0x21   : > { %828 = shalt.err (!%p825_p1)
}
  0x22   : > { %s829_s14 = scalar_lea.vmem %s111_s25, 128  ;;  %p837_p11 = scmp.lt.s32.totalorder %s111_s25, %s111_s25 }
  0x23   : > { %p830_p2 = scmp.ne.s32.totalorder %s111_s25, %s829_s14  ;;  %p838_p6 = scmp.lt.s32.totalorder %s829_s14, %s829_s14 }
  0x25   : > { %p832_p4 = pnand %p830_p2, %p818_p8  ;;  %p839_p13 = por %p838_p6, %p837_p11 }
  0x27   : > { %p833_p12 = pneg %p832_p4 }
  0x29   : > { %p840_p3 = pnand %p839_p13, %p833_p12 }
  0x2b   : > { %843 = shalt.err (!%p840_p3)
}
  0x2c   : > { %728 = dma.hbm_to_vmem [thread:$0]  (!%p1035_p0), %s1195_s0, 128, %s111_s25, [#allocation3]  }
  0x2d   : > { %s679_s19 = sshll.u32 %s944_s12, 12  ;;  %s125_s24 = scalar_lea.vmem [#allocation5], %s635_s29 }
  0x2e   : > { %s132_s30 = sshll.u32 %s125_s24, 4  ;;  %s1066_s5 = scalar_lea.hbm %s1196_s1, %s679_s19  ;;  %s1068_s30 = int_to_ptr.vmem [resolvable:$true] %s132_s30 }
  0x2f   : > { %s1070_s26 = scalar_lea.sflag [#allocation6], %s121_s27  ;;  %s844_s6 = scalar_lea.hbm %s1066_s5, 4096 }
  0x30   : > { %p845_p4 = scmp.ne.s32.totalorder %s1066_s5, %s844_s6  ;;  %p1210_p6 = scmp.ne.s32.totalorder %s1209_s28, 0 }
  0x31   : > { %s849_s7 = scalar_lea.hbm %s1196_s1, 16384  ;;  %p850_p0 = scmp.lt.u32.totalorder %s1066_s5, %s1196_s1 }
  0x32   : > { %p846_p11 = pneg %p1210_p6  ;;  %p851_p3 = scmp.lt.u32.totalorder %s849_s7, %s844_s6 }
  0x33   : > { %p853_p8 = scmp.lt.u32.totalorder %s844_s6, %s1066_s5 }
  0x34   : > { %p847_p12 = pnand %p846_p11, %p845_p4  ;;  %p852_p7 = por %p851_p3, %p850_p0 }
  0x36   : > { %p848_p13 = pneg %p847_p12  ;;  %p854_p9 = por %p853_p8, %p852_p7 }
  0x38   : > { %p855_p10 = pnand %p854_p9, %p848_p13 }
  0x3a   : > { %858 = shalt.err (!%p855_p10)
}
  0x3b   : > { %s859_s27 = scalar_lea.vmem %s1068_s30, 4096  ;;  %s947_s16 = smov [#allocation5]  }
  0x3c   : > { %p860_p5 = scmp.ne.s32.totalorder %s1068_s30, %s859_s27  ;;  %s864_s17 = sshll.u32 %s947_s16, 4  ;;  %s865_s17 = int_to_ptr.vmem [resolvable:$false] %s864_s17 }
  0x3d   : > { %s866_s19 = scalar_lea.vmem %s865_s17, 8192  ;;  %p867_p4 = scmp.lt.s32.totalorder %s1068_s30, %s865_s17 }
  0x3e   : > { %p862_p1 = pnand %p860_p5, %p846_p11  ;;  %p868_p12 = scmp.lt.s32.totalorder %s866_s19, %s859_s27 }
  0x40   : > { %p863_p2 = pneg %p862_p1  ;;  %p869_p0 = por %p868_p12, %p867_p4 }
  0x42   : > { %p870_p3 = pnand %p869_p0, %p863_p2 }
  0x44   : > { %873 = shalt.err (!%p870_p3)
}
  0x45   : > { %s948_s24 = smov 64   ;;  %s949_s3 = smov 4  }
  0x46   : > { %732 = dma.hbm_to_vmem [thread:$0]  (!%p1210_p6), %s1066_s5, 4096, %s1068_s30, %s1070_s26, %s948_s24, %s948_s24, %s949_s3  }
  0x47   : > { %p1211_p11 = scmp.ne.s32.totalorder %s1207_s23, 0 }
  0x48   : > { %p1212_p13 = scmp.eq.s32.totalorder (!%p1211_p11), %s987_s13, 0 }
  0x49   : > { %144 = sbr.rel (%p1211_p11) target bundleno = 395 (0x18b), region = 28 }
  0x50   : > { %919 = dma.done.wait (%p1212_p13), [#allocation3], 128   ;;  %p1213_p7 = pmov %p1212_p13 }
  0x51   : > { %s1105_s4 = sand.u32 1, %s936_s10   ;;  %p1214_p6 = scmp.ne.s32.totalorder %s1204_s20, 0 }
  0x52   : > { %921 = vsyncadd (%p1213_p7), [#allocation3], 4294967168  ;;  %s640_s6 = sshll.u32 %s1105_s4, 8  ;;  %s151_s25 = scalar_lea.sflag [#allocation6], %s1105_s4 }
  0x53   : > { %s1109_s29 = scalar_lea.vmem [#allocation5], %s640_s6 }
  0x54   : > { %923 = dma.done.wait (%p1214_p6), %s151_s25, 4096  }
  0x55   : > { %925 = vsyncadd (%p1214_p6), %s151_s25, 4294963200  ;;  %v776_v0 = vld [vmem:[%s1109_s29 + $0x40] sm:$0xff]   ;;  %v780_v4 = vld [vmem:[%s1109_s29 + $0x48] sm:$0xff]   ;;  %s641_s20 = sshll.u32 %s1105_s4, 5  ;;  %s680_s23 = sshll.u32 %s987_s13, 9 }
  0x56   : > { %v777_v1 = vld [vmem:[%s1109_s29 + $0xc0] sm:$0xff]   ;;  %681 = vmatprep.subr.bf16.mxu0 %v776_v0  ;;  %v781_v5 = vld [vmem:[%s1109_s29 + $0xc8] sm:$0xff]   ;;  %v784_v8 = vld [vmem:[%s1109_s29 + $0x50] sm:$0xff]   ;;  %s174_s28 = scalar_lea.vmem [#allocation7], %s641_s20  ;;  %s1152_s7 = scalar_lea.hbm %s1197_s2, %s680_s23 }
  0x57   : > { %v778_v2 = vld [vmem:[%s1109_s29] sm:$0xff]   ;;  %699 = vmatprep.subr.bf16.mxu1 %v777_v1  ;;  %v782_v6 = vld [vmem:[%s1109_s29 + $0x8] sm:$0xff]   ;;  %v785_v9 = vld [vmem:[%s1109_s29 + $0xd0] sm:$0xff]   ;;  %s549_s30 = sshll.u32 %s174_s28, 4  ;;  %s535_s13 = scalar_lea.sflag [#allocation4], %s1105_s4  ;;  %s1154_s30 = int_to_ptr.vmem [resolvable:$true] %s549_s30 }
  0x58   : > { %v779_v3 = vld [vmem:[%s1109_s29 + $0x80] sm:$0xff]   ;;  %682 = vmatpush3.bf16.xpose.msra.mxu0 %v778_v2  ;;  %v783_v7 = vld [vmem:[%s1109_s29 + $0x88] sm:$0xff]   ;;  %v786_v10 = vld [vmem:[%s1109_s29 + $0x10] sm:$0xff]   ;;  %s874_s8 = scalar_lea.vmem %s1154_s30, 512  ;;  %p1215_p9 = scmp.ne.s32.totalorder %s1205_s21, 0 }
  0x59   : > { %700 = vmatpush3.bf16.xpose.msra.mxu1 %v779_v3  ;;  %683 = vmatprep.subr.bf16.mxu0 %v780_v4  ;;  %v787_v11 = vld [vmem:[%s1109_s29 + $0x90] sm:$0xff]   ;;  %v788_v12 = vld [vmem:[%s1109_s29 + $0x58] sm:$0xff]   ;;  %v792_v16 = vld [vmem:[%s1109_s29 + $0x60] sm:$0xff]   ;;  %p875_p8 = scmp.ne.s32.totalorder %s1154_s30, %s874_s8  ;;  %s950_s14 = smov [#allocation7]  }
  0x5a   : > { %701 = vmatprep.subr.bf16.mxu1 %v781_v5  ;;  %v789_v13 = vld [vmem:[%s1109_s29 + $0xd8] sm:$0xff]   ;;  %v793_v17 = vld [vmem:[%s1109_s29 + $0xe0] sm:$0xff]   ;;  %v796_v21 = vld [vmem:[%s1109_s29 + $0x68] sm:$0xff]   ;;  %s878_s27 = sshll.u32 %s950_s14, 4  ;;  %s879_s27 = int_to_ptr.vmem [resolvable:$false] %s878_s27 }
  0x5b   : > { %v790_v14 = vld [vmem:[%s1109_s29 + $0x18] sm:$0xff]   ;;  %v794_v18 = vld [vmem:[%s1109_s29 + $0x20] sm:$0xff]   ;;  %v797_v23 = vld [vmem:[%s1109_s29 + $0xe8] sm:$0xff]   ;;  %p876_p10 = pnand %p875_p8, %p1215_p9  ;;  %s880_s16 = scalar_lea.vmem %s879_s27, 1024 }
  0x5c   : > { %v791_v15 = vld [vmem:[%s1109_s29 + $0x98] sm:$0xff]   ;;  %v795_v20 = vld [vmem:[%s1109_s29 + $0xa0] sm:$0xff]   ;;  %v798_v24 = vld [vmem:[%s1109_s29 + $0x28] sm:$0xff]   ;;  %p881_p1 = scmp.lt.s32.totalorder %s1154_s30, %s879_s27  ;;  %p882_p2 = scmp.lt.s32.totalorder %s880_s16, %s874_s8 }
  0x5d   : > { %v178_v19 = vld [vmem:[#allocation2] sm:$0xff]  ;;  %v799_v25 = vld [vmem:[%s1109_s29 + $0xa8] sm:$0xff]   ;;  %v800_v26 = vld [vmem:[%s1109_s29 + $0x70] sm:$0xff]   ;;  %p877_p5 = pneg %p876_p10 }
  0x5e   : > { %v243_v22 = vpack.c.bf16 %v178_v19, %v178_v19  ;;  %v801_v27 = vld [vmem:[%s1109_s29 + $0xf0] sm:$0xff]   ;;  %v804_v30 = vld [vmem:[%s1109_s29 + $0x78] sm:$0xff]   ;;  %p883_p4 = por %p882_p2, %p881_p1 }
  0x5f   : > { %v802_v28 = vld [vmem:[%s1109_s29 + $0x30] sm:$0xff]   ;;  %v805_v31 = vld [vmem:[%s1109_s29 + $0xf8] sm:$0xff]  }
  0x60   : > { %684 = vmatpush3.bf16.xpose.msra.mxu0 %v782_v6  ;;  %697 = vmatprep.mubr.bf16.mxu0 %v243_v22  ;;  %v803_v29 = vld [vmem:[%s1109_s29 + $0xb0] sm:$0xff]   ;;  %v806_v32 = vld [vmem:[%s1109_s29 + $0x38] sm:$0xff]   ;;  %p884_p12 = pnand %p883_p4, %p877_p5 }
  0x61   : > { %702 = vmatpush3.bf16.xpose.msra.mxu1 %v783_v7  ;;  %685 = vmatprep.subr.bf16.mxu0 %v784_v8  ;;  %v807_v33 = vld [vmem:[%s1109_s29 + $0xb8] sm:$0xff]  }
  0x62   : > { %703 = vmatprep.subr.bf16.mxu1 %v785_v9  ;;  %715 = vmatprep.mubr.bf16.mxu1 %v243_v22 }
  0x68   : > { %686 = vmatpush3.bf16.xpose.msra.mxu0 %v786_v10 }
  0x69   : > { %704 = vmatpush3.bf16.xpose.msra.mxu1 %v787_v11  ;;  %687 = vmatprep.subr.bf16.mxu0 %v788_v12 }
  0x6a   : > { %705 = vmatprep.subr.bf16.mxu1 %v789_v13 }
  0x70   : > { %688 = vmatpush3.bf16.xpose.msra.mxu0 %v790_v14 }
  0x71   : > { %706 = vmatpush3.bf16.xpose.msra.mxu1 %v791_v15  ;;  %689 = vmatprep.subr.bf16.mxu0 %v792_v16 }
  0x72   : > { %707 = vmatprep.subr.bf16.mxu1 %v793_v17 }
  0x78   : > { %690 = vmatpush3.bf16.xpose.msra.mxu0 %v794_v18 }
  0x79   : > { %708 = vmatpush3.bf16.xpose.msra.mxu1 %v795_v20  ;;  %691 = vmatprep.subr.bf16.mxu0 %v796_v21 }
  0x7a   : > { %709 = vmatprep.subr.bf16.mxu1 %v797_v23 }
  0x80   : > { %692 = vmatpush3.bf16.xpose.msra.mxu0 %v798_v24 }
  0x81   : > { %710 = vmatpush3.bf16.xpose.msra.mxu1 %v799_v25  ;;  %693 = vmatprep.subr.bf16.mxu0 %v800_v26 }
  0x82   : > { %711 = vmatprep.subr.bf16.mxu1 %v801_v27 }
  0x88   : > { %694 = vmatpush3.bf16.xpose.msra.mxu0 %v802_v28 }
  0x89   : > { %712 = vmatpush3.bf16.xpose.msra.mxu1 %v803_v29  ;;  %695 = vmatprep.subr.bf16.mxu0 %v804_v30 }
  0x8a   : > { %713 = vmatprep.subr.bf16.mxu1 %v805_v31 }
  0x90   : > { %696 = vmatpush3.bf16.xpose.msra.mxu0 %v806_v32 }
  0x91   : > { %714 = vmatpush3.bf16.xpose.msra.mxu1 %v807_v33 }
  0x97   : > { %698 = vmatmul.mubr.bf16.vlgmr.msra.gmra.mrb[0].mxu0 %v243_v22 }
  0x98   : > { %716 = vmatmul.mubr.bf16.vlgmr.msra.gmra.mrb[0].mxu1 %v243_v22 }
 0x16a   : > { %v470_v34 = vpop.f32.mrb[0].mxu0 }
 0x16b   : > { %v518_v35 = vmul.f32 14.285714, %v470_v34  ;;  %v511_v36 = vpop.f32.mrb[0].mxu1  ;;  %v472_v37 = vpop.f32.mrb[1].mxu0 }
 0x16c   : > { %v520_v38 = vmul.f32 14.285714, %v511_v36  ;;  %v519_v39 = vmul.f32 14.285714, %v472_v37  ;;  %v513_v40 = vpop.f32.mrb[1].mxu1  ;;  %v474_v41 = vpop.f32.mrb[2].mxu0 }
 0x16d   : > { %v522_v42 = vmul.f32 1.442695, %v518_v35  ;;  %v521_v43 = vmul.f32 14.285714, %v513_v40  ;;  %v515_v44 = vpop.f32.mrb[2].mxu1  ;;  %v475_v45 = vpop.f32.mrb[3].mxu0 }
 0x16e   : > { %v526_v46 = vmul.f32 1.442695, %v520_v38  ;;  %v524_v47 = vmul.f32 1.442695, %v519_v39  ;;  %v516_v48 = vpop.f32.mrb[3].mxu1 }
 0x16f   : > { %808 = vpow2.f32 %v522_v42  ;;  %v528_v49 = vmul.f32 1.442695, %v521_v43 }
 0x170   : > { %810 = vpow2.f32 %v526_v46 }
 0x171   : > { %812 = vpow2.f32 %v524_v47 }
 0x172   : > { %814 = vpow2.f32 %v528_v49 }
 0x179   : > { %v809_v50 = vpop.eup %808 }
 0x17a   : > { %v811_v51 = vpop.eup %810  ;;  %530 = vst [vmem:[%s174_s28] sm:$0xff] %v809_v50 }
 0x17b   : > { %v813_v52 = vpop.eup %812  ;;  %532 = vst [vmem:[%s174_s28 + $0x10] sm:$0xff] %v811_v51 }
 0x17c   : > { %v815_v53 = vpop.eup %814  ;;  %531 = vst [vmem:[%s174_s28 + $0x8] sm:$0xff] %v813_v52 }
 0x17d   : > { %533 = vst [vmem:[%s174_s28 + $0x18] sm:$0xff] %v815_v53 }
 0x17e   : > { %887 = shalt.err (!%p884_p12)
}
 0x17f   : > { %s888_s17 = scalar_lea.hbm %s1152_s7, 512  ;;  %s892_s3 = scalar_lea.hbm %s1197_s2, 2048 }
 0x180   : > { %p889_p0 = scmp.ne.s32.totalorder %s1152_s7, %s888_s17  ;;  %p893_p13 = scmp.lt.u32.totalorder %s1152_s7, %s1197_s2 }
 0x181   : > { %p894_p7 = scmp.lt.u32.totalorder %s892_s3, %s888_s17  ;;  %p896_p8 = scmp.lt.u32.totalorder %s888_s17, %s1152_s7 }
 0x182   : > { %p890_p3 = pnand %p889_p0, %p1215_p9 }
 0x183   : > { %p895_p6 = por %p894_p7, %p893_p13 }
 0x184   : > { %p891_p11 = pneg %p890_p3 }
 0x185   : > { %p897_p10 = por %p896_p8, %p895_p6 }
 0x187   : > { %p898_p5 = pnand %p897_p10, %p891_p11 }
 0x189   : > { %901 = shalt.err (!%p898_p5)
}
 0x18a   : > { %723 = dma.vmem_to_hbm [thread:$0]  (%p1215_p9), %s1154_s30, 512, %s1152_s7, %s535_s13  }
 0x18b PF: > { %p740_p1 = scmp.ge.s32.totalorder %s944_s12, 2  ;;  %s561_s25 = sand.u32 1, %s932_s9  }
 0x18c   : > { %p1216_p2 = scmp.ne.s32.totalorder %s1206_s22, 0  ;;  %s562_s29 = scalar_lea.sflag [#allocation4], %s561_s25 }
 0x18e   : > { %p734_p4 = pnand %p740_p1, %p1216_p2 }
 0x190   : > { %927 = dma.done.wait (!%p734_p4), %s562_s29, 512  }
 0x191   : > { %929 = vsyncadd (!%p734_p4), %s562_s29, 4294966784  ;;  %p16_p12 = scmp.ge.s32.totalorder %s991_s15, 6   ;;  %s1217_s9 = smov %s936_s10 }
 0x192   : > { %s1218_s10 = smov %s940_s11  ;;  %s1219_s11 = smov %s1003_s18 }
 0x193   : > { %s1220_s12 = smov %s991_s15  ;;  %18 = sbr.rel (!%p16_p12) target bundleno = 6 (0x6), region = 78 }
 0x19a   :  { %567 = vsyncpa [#allocation3], 1 }
 0x19b   :  { %569 = vsyncpa [#allocation3 + $0x1], 1 }
 0x19c   :  { %570 = vsyncpa [#allocation6], 1 }
 0x19d   :  { %572 = vsyncpa [#allocation6 + $0x1], 1 }
 0x19e   :  { %573 = vsyncpa [#allocation4], 1 }
 0x19f   :  { %575 = vsyncpa [#allocation4 + $0x1], 1 }

</bundles_post_ra>
